<compile_context>
chip_gen: v5e
topology: v5e:2x2
jax: 0.10.0
libtpu: 0.0.40
codegen_flags: <defaults>
</compile_context>

<pallas_src>
import jax
import jax.numpy as jnp
from jax import lax
from jax.experimental import pallas as pl
from jax.experimental.pallas import tpu as pltpu


# -----------------------------------------------------------------------------
# Pallas kernel: two 2-layer MLP towers + cosine similarity + sigmoid.
# Inputs are batch-major (TILE_B, Din); all post-matmul activations are
# feature-major (features, TILE_B) so batch lives on the 128-wide lane axis.
# -----------------------------------------------------------------------------
def dssm_kernel(xu_ref, xi_ref,
                w1u_ref, b1u_ref, w2u_ref, b2u_ref,
                w1i_ref, b1i_ref, w2i_ref, b2i_ref,
                out_ref):
    # xu_ref : (TILE_B, Din_u)   input dtype (f32 or bf16), cast to bf16 in-kernel
    # xi_ref : (TILE_B, Din_i)
    # w1*    : (H1, Din)  bf16   (BN folded, transposed to out-major)
    # b1*    : (H1, 1)    f32
    # w2*    : (H2, H1)   bf16
    # b2*    : (H2, 1)    f32
    # out    : (1, 1, TILE_B) f32
    dims = (((1,), (1,)), ((), ()))  # contract the feature axis of (TILE_B, Din)

    # ---- user tower ---------------------------------------------------------
    xu = xu_ref[...].astype(jnp.bfloat16)                           # (TILE_B, Din_u)
    h1u = lax.dot_general(w1u_ref[...], xu, dims,
                          preferred_element_type=jnp.float32) + b1u_ref[...]
    h1u = jnp.maximum(h1u, 0.0).astype(jnp.bfloat16)                # (H1u, TILE_B) bf16
    h2u = jnp.dot(w2u_ref[...], h1u,
                  preferred_element_type=jnp.float32) + b2u_ref[...]
    u = jnp.maximum(h2u, 0.0)                                       # (H2u, TILE_B) f32

    # ---- item tower ---------------------------------------------------------
    xi = xi_ref[...].astype(jnp.bfloat16)                           # (TILE_B, Din_i)
    h1i = lax.dot_general(w1i_ref[...], xi, dims,
                          preferred_element_type=jnp.float32) + b1i_ref[...]
    h1i = jnp.maximum(h1i, 0.0).astype(jnp.bfloat16)                # (H1i, TILE_B) bf16
    h2i = jnp.dot(w2i_ref[...], h1i,
                  preferred_element_type=jnp.float32) + b2i_ref[...]
    v = jnp.maximum(h2i, 0.0)                                       # (H2i, TILE_B) f32

    # ---- cosine_similarity(dim=1) + sigmoid ---------------------------------
    dot = jnp.sum(u * v, axis=0, keepdims=True)                     # (1, TILE_B)
    u2 = jnp.sum(u * u, axis=0, keepdims=True)
    v2 = jnp.sum(v * v, axis=0, keepdims=True)
    eps2 = jnp.float32(1e-8) ** 2       # sqrt(max(u2, eps^2)) == max(||u||, eps)
    cos = dot * lax.rsqrt(jnp.maximum(u2, eps2)) \
              * lax.rsqrt(jnp.maximum(v2, eps2))
    out_ref[0] = jax.nn.sigmoid(cos)                                # lane-dense store


# -----------------------------------------------------------------------------
# Wrapper helpers: BN folding, tile / VMEM-limit selection.
# -----------------------------------------------------------------------------
def _cdiv(a, b):
    return -(-a // b)


def _round_up(x, m):
    return _cdiv(x, m) * m


def _fold_bn(layer):
    # Linear: y = x @ W + b   (W: (in,out), b: (1,out)); BN(eval): y*s + t
    W, b, s, t = layer
    return W * s, b * s + t


def _vmem_estimate(tile_b, din_u, din_i, h1u, h1i, h2u, h2i, n_buf):
    """Generous per-tile VMEM footprint estimate in bytes."""
    per_col = 4 * n_buf * (din_u + din_i)        # input tiles (f32, n_buf-deep)
    per_col += 6 * (h1u + h1i)                   # h1 f32 + bf16 copy
    per_col += 16 * (h2u + h2i)                  # h2/u/v f32 + elementwise temps
    per_col += 4 * 8                             # reduction rows + out buffers
    weights = 2 * (h1u * din_u + h1i * din_i + h2u * h1u + h2i * h1i) \
              + 4 * (h1u + h1i + h2u + h2i)      # bf16 weights + f32 biases
    return per_col * tile_b + 2 * weights + (2 << 20)   # + slack


def _choose_tiling(B, din_u, din_i, h1u, h1i, h2u, h2i,
                   cap=8192, budget=32 << 20):
    """Pick (tile_b, grid_b, B_pad, vmem_limit_bytes).

    - tile as big as the VMEM budget allows (amortizes per-step overhead),
    - grid_b >= 2 whenever B allows it (both v7x TensorCores get work),
    - tile_b sized from cdiv(B, n_tiles) so padding waste is <= ~128 cols/tile.
    """
    B128 = _round_up(max(B, 1), 128)
    while True:
        n = max(_cdiv(B128, cap), 1)
        if B128 >= 256:
            n = max(n, 2)                        # keep >= 2 grid steps (v7x megacore)
        tile_b = _round_up(_cdiv(B128, n), 128)
        grid_b = _cdiv(B128, tile_b)
        n_buf = 3 if grid_b >= 3 else 2
        est = _vmem_estimate(tile_b, din_u, din_i, h1u, h1i, h2u, h2i, n_buf)
        if est <= budget or tile_b <= 128:
            break
        cap = max(tile_b // 2, 128)              # shrink and retry
    vmem_limit = int(min(max(2 * est, 24 << 20), 60 << 20))   # < v7x 64 MiB physical
    return tile_b, grid_b, tile_b * grid_b, n_buf, vmem_limit


# -----------------------------------------------------------------------------
# Wrapper: fold BN, tile over batch, run the kernel.
# -----------------------------------------------------------------------------
def dssm_pallas(input_user, input_item, user_tower_params, item_tower_params,
                tile_b_cap=8192):
    """input_user: (B, user_dims), input_item: (B, item_dims) — batch-major,
    f32 or bf16.  *_tower_params: list of 2 layers, each
    (W(in,out), b(1,out), bn_scale(1,out), bn_shift(1,out))."""
    B, din_u = input_user.shape
    din_i = input_item.shape[1]
    assert user_tower_params[-1][0].shape[1] == item_tower_params[-1][0].shape[1], \
        "cosine similarity requires equal final tower dims"

    # --- fold BN(eval) into the linears; transpose to out-major; bf16 operands
    (uW1, ub1), (uW2, ub2) = [_fold_bn(l) for l in user_tower_params]
    (iW1, ib1), (iW2, ib2) = [_fold_bn(l) for l in item_tower_params]
    W1u = uW1.T.astype(jnp.bfloat16)      # (H1u, Din_u)
    W2u = uW2.T.astype(jnp.bfloat16)      # (H2u, H1u)
    W1i = iW1.T.astype(jnp.bfloat16)
    W2i = iW2.T.astype(jnp.bfloat16)
    b1u, b2u = ub1.T, ub2.T               # (H, 1) f32
    b1i, b2i = ib1.T, ib2.T

    h1u_, h2u_ = W1u.shape[0], W2u.shape[0]
    h1i_, h2i_ = W1i.shape[0], W2i.shape[0]

    tile_b, grid_b, B_pad, n_buf, vmem_limit = _choose_tiling(
        B, din_u, din_i, h1u_, h1i_, h2u_, h2i_, cap=tile_b_cap)

    # TODO(synk): fusing the embedding gather itself (scalar-prefetched ids +
    # in-kernel row gather) would remove the remaining HBM pass of user_emb/item_emb.
    if B_pad != B:
        pad = B_pad - B
        input_user = jnp.pad(input_user, ((0, pad), (0, 0)))
        input_item = jnp.pad(input_item, ((0, pad), (0, 0)))

    in_buf = pl.Buffered(n_buf)           # deeper input pipeline when grid is deep
    const2 = lambda i: (0, 0)             # weights/biases: VMEM-resident across steps

    out = pl.pallas_call(
        dssm_kernel,
        out_shape=jax.ShapeDtypeStruct((grid_b, 1, tile_b), jnp.float32),
        grid_spec=pltpu.PrefetchScalarGridSpec(
            num_scalar_prefetch=0,
            grid=(grid_b,),
            in_specs=[
                # batch-tiled activations, multi-buffered
                pl.BlockSpec((tile_b, din_u), lambda i: (i, 0), pipeline_mode=in_buf),
                pl.BlockSpec((tile_b, din_i), lambda i: (i, 0), pipeline_mode=in_buf),
                # user tower params (fetched once)
                pl.BlockSpec(W1u.shape, const2), pl.BlockSpec(b1u.shape, const2),
                pl.BlockSpec(W2u.shape, const2), pl.BlockSpec(b2u.shape, const2),
                # item tower params (fetched once)
                pl.BlockSpec(W1i.shape, const2), pl.BlockSpec(b1i.shape, const2),
                pl.BlockSpec(W2i.shape, const2), pl.BlockSpec(b2i.shape, const2),
            ],
            out_specs=pl.BlockSpec((1, 1, tile_b), lambda i: (i, 0, 0)),
        ),
        compiler_params=pltpu.CompilerParams(
            dimension_semantics=("parallel",),   # shards batch grid across v7x's 2 TCs
            vmem_limit_bytes=vmem_limit,         # derived from actual tile footprint
        ),
    )(input_user, input_item, W1u, b1u, W2u, b2u, W1i, b1i, W2i, b2i)

    return out.reshape(-1)[:B]                   # (B,)


# -----------------------------------------------------------------------------
# Parameter / input construction (deterministic, in-script).
# -----------------------------------------------------------------------------
def make_linear(key, in_dim, out_dim):
    # Weight stored as (in_dim, out_dim)  (transposed vs torch's (out,in)).
    kw, kb = jax.random.split(key)
    bound = 1.0 / jnp.sqrt(in_dim)
    W = jax.random.uniform(kw, (in_dim, out_dim), jnp.float32, -bound, bound)
    b = jax.random.uniform(kb, (1, out_dim), jnp.float32, -bound, bound)
    return W, b


def make_bn_eval(dim):
    # Fresh BatchNorm1d in eval mode: running_mean=0, running_var=1, gamma=1, beta=0.
    eps = 1e-5
    gamma = jnp.ones((1, dim), jnp.float32)
    beta = jnp.zeros((1, dim), jnp.float32)
    running_mean = jnp.zeros((1, dim), jnp.float32)
    running_var = jnp.ones((1, dim), jnp.float32)
    scale = gamma / jnp.sqrt(running_var + eps)
    shift = beta - running_mean * scale
    return scale, shift


def make_tower(key, in_dim, dims):
    params = []
    keys = jax.random.split(key, len(dims))
    d_in = in_dim
    for k, d_out in zip(keys, dims):
        W, b = make_linear(k, d_in, d_out)
        s, t = make_bn_eval(d_out)
        params.append((W, b, s, t))
        d_in = d_out
    return params


def ref_dssm(user_emb, item_emb, user_tower, item_tower):
    # Pure-JAX f32 reference of the original (unfolded) eval-mode forward.
    def tower(x, params):
        h = x
        for (W, b, s, t) in params:
            h = h @ W + b
            h = h * s + t
            h = jnp.maximum(h, 0.0)
        return h
    u = tower(user_emb, user_tower)
    v = tower(item_emb, item_tower)
    eps = 1e-8
    un = jnp.maximum(jnp.sqrt(jnp.sum(u * u, axis=1)), eps)
    vn = jnp.maximum(jnp.sqrt(jnp.sum(v * v, axis=1)), eps)
    return jax.nn.sigmoid(jnp.sum(u * v, axis=1) / (un * vn))


if __name__ == "__main__":
    # Small, DSSM-consistent shapes.
    B = 8                      # batch
    n_user_feats = 2           # two user sparse features
    n_item_feats = 2           # two item sparse features
    embed_dim = 16             # per-feature embedding dim
    vocab = 100
    user_dims = n_user_feats * embed_dim   # 32
    item_dims = n_item_feats * embed_dim   # 32
    tower_dims = [64, 32]      # user_params["dims"] == item_params["dims"]

    key = jax.random.PRNGKey(0)
    k_emb, k_ids, k_ut, k_it = jax.random.split(key, 4)

    # Embedding tables for user + item sparse features (EmbeddingLayer).
    emb_keys = jax.random.split(k_emb, n_user_feats + n_item_feats)
    tables = [0.01 * jax.random.normal(k, (vocab, embed_dim), jnp.float32)
              for k in emb_keys]

    # Input x: one integer id column per sparse feature, shape (B,).
    id_keys = jax.random.split(k_ids, n_user_feats + n_item_feats)
    ids = [jax.random.randint(k, (B,), 0, vocab) for k in id_keys]

    # Embedding lookup + concat (squeeze_dim=True) -- glue, plain JAX.
    user_emb = jnp.concatenate(
        [jnp.take(tables[f], ids[f], axis=0) for f in range(n_user_feats)], axis=1)
    item_emb = jnp.concatenate(
        [jnp.take(tables[n_user_feats + f], ids[n_user_feats + f], axis=0)
         for f in range(n_item_feats)], axis=1)

    # Tower parameters (Linear + BatchNorm1d eval; Dropout is identity at inference).
    user_tower = make_tower(k_ut, user_dims, tower_dims)
    item_tower = make_tower(k_it, item_dims, tower_dims)

    y = dssm_pallas(user_emb, item_emb, user_tower, item_tower)
    y = jax.block_until_ready(y)
    assert y.shape == (B,)
    assert bool(jnp.all(jnp.isfinite(y)))

    # Correctness vs. f32 reference (bf16 MXU operands -> loose tolerance).
    y_ref = ref_dssm(user_emb, item_emb, user_tower, item_tower)
    assert float(jnp.max(jnp.abs(y - y_ref))) < 2e-2

    print("KERNEL_OK")
</pallas_src>

<mosaic_0001>
module attributes {stable_mosaic.version = 11 : i64} {
  func.func @dssm_kernel(%arg0: i32, %arg1: memref<128x32xf32, #tpu.memory_space<vmem>>, %arg2: memref<128x32xf32, #tpu.memory_space<vmem>>, %arg3: memref<64x32xbf16, #tpu.memory_space<vmem>>, %arg4: memref<64x1xf32, #tpu.memory_space<vmem>>, %arg5: memref<32x64xbf16, #tpu.memory_space<vmem>>, %arg6: memref<32x1xf32, #tpu.memory_space<vmem>>, %arg7: memref<64x32xbf16, #tpu.memory_space<vmem>>, %arg8: memref<64x1xf32, #tpu.memory_space<vmem>>, %arg9: memref<32x64xbf16, #tpu.memory_space<vmem>>, %arg10: memref<32x1xf32, #tpu.memory_space<vmem>>, %arg11: memref<1x1x128xf32, #tpu.memory_space<vmem>>) attributes {dimension_semantics = [#tpu.dimension_semantics<parallel>], iteration_bounds = array<i64: 1>, scalar_prefetch = 0 : i64, scratch_operands = 0 : i64, tpu.core_type = #tpu.core_type<tc>, window_params = [{pipeline_mode = #tpu.pipeline_mode<double_buffered>, transform_indices = @transform_0, window_bounds = array<i64: 128, 32>}, {pipeline_mode = #tpu.pipeline_mode<double_buffered>, transform_indices = @transform_1, window_bounds = array<i64: 128, 32>}, {pipeline_mode = #tpu.pipeline_mode<synchronous>, transform_indices = @transform_2, window_bounds = array<i64: 64, 32>}, {pipeline_mode = #tpu.pipeline_mode<synchronous>, transform_indices = @transform_3, window_bounds = array<i64: 64, 1>}, {pipeline_mode = #tpu.pipeline_mode<synchronous>, transform_indices = @transform_4, window_bounds = array<i64: 32, 64>}, {pipeline_mode = #tpu.pipeline_mode<synchronous>, transform_indices = @transform_5, window_bounds = array<i64: 32, 1>}, {pipeline_mode = #tpu.pipeline_mode<synchronous>, transform_indices = @transform_6, window_bounds = array<i64: 64, 32>}, {pipeline_mode = #tpu.pipeline_mode<synchronous>, transform_indices = @transform_7, window_bounds = array<i64: 64, 1>}, {pipeline_mode = #tpu.pipeline_mode<synchronous>, transform_indices = @transform_8, window_bounds = array<i64: 32, 64>}, {pipeline_mode = #tpu.pipeline_mode<synchronous>, transform_indices = @transform_9, window_bounds = array<i64: 32, 1>}, {transform_indices = @transform_10, window_bounds = array<i64: 1, 1, 128>}]} {
    %c0 = arith.constant 0 : index
    %c0_0 = arith.constant 0 : index
    %0 = vector.load %arg1[%c0, %c0_0] : memref<128x32xf32, #tpu.memory_space<vmem>>, vector<128x32xf32>
    %1 = arith.truncf %0 : vector<128x32xf32> to vector<128x32xbf16>
    %c0_1 = arith.constant 0 : index
    %c0_2 = arith.constant 0 : index
    %2 = vector.load %arg3[%c0_1, %c0_2] : memref<64x32xbf16, #tpu.memory_space<vmem>>, vector<64x32xbf16>
    %cst = arith.constant dense<0.000000e+00> : vector<64x128xf32>
    %3 = tpu.matmul %2, %1, %cst {dimension_numbers = #tpu.dot_dimension_numbers<[1], [1], [0], [0], [0, 0, 1, 0], [], []>} : vector<64x32xbf16>, vector<128x32xbf16>, vector<64x128xf32> -> vector<64x128xf32>
    %c0_3 = arith.constant 0 : index
    %c0_4 = arith.constant 0 : index
    %4 = vector.load %arg4[%c0_3, %c0_4] : memref<64x1xf32, #tpu.memory_space<vmem>>, vector<64x1xf32>
    %5 = vector.broadcast %4 : vector<64x1xf32> to vector<64x128xf32>
    %6 = arith.addf %3, %5 : vector<64x128xf32>
    %cst_5 = arith.constant 0.000000e+00 : f32
    %7 = vector.broadcast %cst_5 : f32 to vector<64x128xf32>
    %8 = arith.maximumf %6, %7 : vector<64x128xf32>
    %9 = arith.truncf %8 : vector<64x128xf32> to vector<64x128xbf16>
    %c0_6 = arith.constant 0 : index
    %c0_7 = arith.constant 0 : index
    %10 = vector.load %arg5[%c0_6, %c0_7] : memref<32x64xbf16, #tpu.memory_space<vmem>>, vector<32x64xbf16>
    %cst_8 = arith.constant dense<0.000000e+00> : vector<32x128xf32>
    %11 = tpu.matmul %10, %9, %cst_8 {dimension_numbers = #tpu.dot_dimension_numbers<[1], [0], [0], [1], [0, 0, 1, 1], [], []>} : vector<32x64xbf16>, vector<64x128xbf16>, vector<32x128xf32> -> vector<32x128xf32>
    %c0_9 = arith.constant 0 : index
    %c0_10 = arith.constant 0 : index
    %12 = vector.load %arg6[%c0_9, %c0_10] : memref<32x1xf32, #tpu.memory_space<vmem>>, vector<32x1xf32>
    %13 = vector.broadcast %12 : vector<32x1xf32> to vector<32x128xf32>
    %14 = arith.addf %11, %13 : vector<32x128xf32>
    %cst_11 = arith.constant 0.000000e+00 : f32
    %15 = vector.broadcast %cst_11 : f32 to vector<32x128xf32>
    %16 = arith.maximumf %14, %15 : vector<32x128xf32>
    %c0_12 = arith.constant 0 : index
    %c0_13 = arith.constant 0 : index
    %17 = vector.load %arg2[%c0_12, %c0_13] : memref<128x32xf32, #tpu.memory_space<vmem>>, vector<128x32xf32>
    %18 = arith.truncf %17 : vector<128x32xf32> to vector<128x32xbf16>
    %c0_14 = arith.constant 0 : index
    %c0_15 = arith.constant 0 : index
    %19 = vector.load %arg7[%c0_14, %c0_15] : memref<64x32xbf16, #tpu.memory_space<vmem>>, vector<64x32xbf16>
    %cst_16 = arith.constant dense<0.000000e+00> : vector<64x128xf32>
    %20 = tpu.matmul %19, %18, %cst_16 {dimension_numbers = #tpu.dot_dimension_numbers<[1], [1], [0], [0], [0, 0, 1, 0], [], []>} : vector<64x32xbf16>, vector<128x32xbf16>, vector<64x128xf32> -> vector<64x128xf32>
    %c0_17 = arith.constant 0 : index
    %c0_18 = arith.constant 0 : index
    %21 = vector.load %arg8[%c0_17, %c0_18] : memref<64x1xf32, #tpu.memory_space<vmem>>, vector<64x1xf32>
    %22 = vector.broadcast %21 : vector<64x1xf32> to vector<64x128xf32>
    %23 = arith.addf %20, %22 : vector<64x128xf32>
    %cst_19 = arith.constant 0.000000e+00 : f32
    %24 = vector.broadcast %cst_19 : f32 to vector<64x128xf32>
    %25 = arith.maximumf %23, %24 : vector<64x128xf32>
    %26 = arith.truncf %25 : vector<64x128xf32> to vector<64x128xbf16>
    %c0_20 = arith.constant 0 : index
    %c0_21 = arith.constant 0 : index
    %27 = vector.load %arg9[%c0_20, %c0_21] : memref<32x64xbf16, #tpu.memory_space<vmem>>, vector<32x64xbf16>
    %cst_22 = arith.constant dense<0.000000e+00> : vector<32x128xf32>
    %28 = tpu.matmul %27, %26, %cst_22 {dimension_numbers = #tpu.dot_dimension_numbers<[1], [0], [0], [1], [0, 0, 1, 1], [], []>} : vector<32x64xbf16>, vector<64x128xbf16>, vector<32x128xf32> -> vector<32x128xf32>
    %c0_23 = arith.constant 0 : index
    %c0_24 = arith.constant 0 : index
    %29 = vector.load %arg10[%c0_23, %c0_24] : memref<32x1xf32, #tpu.memory_space<vmem>>, vector<32x1xf32>
    %30 = vector.broadcast %29 : vector<32x1xf32> to vector<32x128xf32>
    %31 = arith.addf %28, %30 : vector<32x128xf32>
    %cst_25 = arith.constant 0.000000e+00 : f32
    %32 = vector.broadcast %cst_25 : f32 to vector<32x128xf32>
    %33 = arith.maximumf %31, %32 : vector<32x128xf32>
    %34 = arith.mulf %16, %33 : vector<32x128xf32>
    %cst_26 = arith.constant dense<0.000000e+00> : vector<128xf32>
    %35 = vector.multi_reduction <add>, %34, %cst_26 [0] : vector<32x128xf32> to vector<128xf32>
    %36 = vector.shape_cast %35 : vector<128xf32> to vector<1x128xf32>
    %37 = arith.mulf %16, %16 : vector<32x128xf32>
    %cst_27 = arith.constant dense<0.000000e+00> : vector<128xf32>
    %38 = vector.multi_reduction <add>, %37, %cst_27 [0] : vector<32x128xf32> to vector<128xf32>
    %39 = vector.shape_cast %38 : vector<128xf32> to vector<1x128xf32>
    %40 = arith.mulf %33, %33 : vector<32x128xf32>
    %cst_28 = arith.constant dense<0.000000e+00> : vector<128xf32>
    %41 = vector.multi_reduction <add>, %40, %cst_28 [0] : vector<32x128xf32> to vector<128xf32>
    %42 = vector.shape_cast %41 : vector<128xf32> to vector<1x128xf32>
    %cst_29 = arith.constant 9.99999993E-9 : f32
    %43 = arith.mulf %cst_29, %cst_29 : f32
    %44 = vector.broadcast %43 : f32 to vector<1x128xf32>
    %45 = arith.maximumf %39, %44 : vector<1x128xf32>
    %46 = math.rsqrt %45 : vector<1x128xf32>
    %47 = arith.mulf %36, %46 : vector<1x128xf32>
    %48 = vector.broadcast %43 : f32 to vector<1x128xf32>
    %49 = arith.maximumf %42, %48 : vector<1x128xf32>
    %50 = math.rsqrt %49 : vector<1x128xf32>
    %51 = arith.mulf %47, %50 : vector<1x128xf32>
    %52 = arith.negf %51 : vector<1x128xf32>
    %53 = math.exp %52 : vector<1x128xf32>
    %cst_30 = arith.constant 1.000000e+00 : f32
    %54 = vector.broadcast %cst_30 : f32 to vector<1x128xf32>
    %55 = arith.addf %54, %53 : vector<1x128xf32>
    %56 = arith.divf %54, %55 : vector<1x128xf32>
    %c0_31 = arith.constant 0 : index
    %c0_32 = arith.constant 0 : index
    %c0_33 = arith.constant 0 : index
    %57 = vector.load %arg11[%c0_31, %c0_32, %c0_33] : memref<1x1x128xf32, #tpu.memory_space<vmem>>, vector<1x1x128xf32>
    %58 = vector.shape_cast %57 : vector<1x1x128xf32> to vector<1x128xf32>
    %59 = vector.shape_cast %56 : vector<1x128xf32> to vector<1x1x128xf32>
    tpu.vector_store %arg11[%c0_31, %c0_32, %c0_33], %59 {strides = array<i32>} : memref<1x1x128xf32, #tpu.memory_space<vmem>>, vector<1x1x128xf32>,
    return
  }
  func.func @transform_0(%arg0: i32) -> (i32, i32) {
    %c0_i32 = arith.constant 0 : i32
    %c0_i32_0 = arith.constant 0 : i32
    return %arg0, %c0_i32 : i32, i32
  }
  func.func @transform_1(%arg0: i32) -> (i32, i32) {
    %c0_i32 = arith.constant 0 : i32
    %c0_i32_0 = arith.constant 0 : i32
    return %arg0, %c0_i32 : i32, i32
  }
  func.func @transform_2(%arg0: i32) -> (i32, i32) {
    %c0_i32 = arith.constant 0 : i32
    %c0_i32_0 = arith.constant 0 : i32
    %c0_i32_1 = arith.constant 0 : i32
    return %c0_i32, %c0_i32_0 : i32, i32
  }
  func.func @transform_3(%arg0: i32) -> (i32, i32) {
    %c0_i32 = arith.constant 0 : i32
    %c0_i32_0 = arith.constant 0 : i32
    %c0_i32_1 = arith.constant 0 : i32
    return %c0_i32, %c0_i32_0 : i32, i32
  }
  func.func @transform_4(%arg0: i32) -> (i32, i32) {
    %c0_i32 = arith.constant 0 : i32
    %c0_i32_0 = arith.constant 0 : i32
    %c0_i32_1 = arith.constant 0 : i32
    return %c0_i32, %c0_i32_0 : i32, i32
  }
  func.func @transform_5(%arg0: i32) -> (i32, i32) {
    %c0_i32 = arith.constant 0 : i32
    %c0_i32_0 = arith.constant 0 : i32
    %c0_i32_1 = arith.constant 0 : i32
    return %c0_i32, %c0_i32_0 : i32, i32
  }
  func.func @transform_6(%arg0: i32) -> (i32, i32) {
    %c0_i32 = arith.constant 0 : i32
    %c0_i32_0 = arith.constant 0 : i32
    %c0_i32_1 = arith.constant 0 : i32
    return %c0_i32, %c0_i32_0 : i32, i32
  }
  func.func @transform_7(%arg0: i32) -> (i32, i32) {
    %c0_i32 = arith.constant 0 : i32
    %c0_i32_0 = arith.constant 0 : i32
    %c0_i32_1 = arith.constant 0 : i32
    return %c0_i32, %c0_i32_0 : i32, i32
  }
  func.func @transform_8(%arg0: i32) -> (i32, i32) {
    %c0_i32 = arith.constant 0 : i32
    %c0_i32_0 = arith.constant 0 : i32
    %c0_i32_1 = arith.constant 0 : i32
    return %c0_i32, %c0_i32_0 : i32, i32
  }
  func.func @transform_9(%arg0: i32) -> (i32, i32) {
    %c0_i32 = arith.constant 0 : i32
    %c0_i32_0 = arith.constant 0 : i32
    %c0_i32_1 = arith.constant 0 : i32
    return %c0_i32, %c0_i32_0 : i32, i32
  }
  func.func @transform_10(%arg0: i32) -> (i32, i32, i32) {
    %c0_i32 = arith.constant 0 : i32
    %c0_i32_0 = arith.constant 0 : i32
    %c0_i32_1 = arith.constant 0 : i32
    return %arg0, %c0_i32, %c0_i32_0 : i32, i32, i32
  }
}

</mosaic_0001>

<bundles_post_ra>
// kernel: tpu_custom_call.1
= control target key start
LH: loop header
LB: loop body
LE: loop exit
PB: predicated region body
PF: predicated region fallthrough
CT: control target
= control target key end

     0   :  { %vm137_vm0 = vcmask 261120   ;;  %v754_v14 = vmov 0   ;;  %s1042_s0 = inlined_call_operand.vmem [shape: f32[128,32], index: 0, kind: input, shape index: {}]   ;;  %s1043_s1 = inlined_call_operand.vmem [shape: f32[128,32], index: 1, kind: input, shape index: {}]   ;;  %s1044_s2 = inlined_call_operand.vmem [shape: bf16[64,32], index: 2, kind: input, shape index: {}]   ;;  %s1045_s3 = inlined_call_operand.vmem [shape: f32[64,1], index: 3, kind: input, shape index: {}]   ;;  %s1046_s4 = inlined_call_operand.vmem [shape: bf16[32,64], index: 4, kind: input, shape index: {}]   ;;  %s1047_s5 = inlined_call_operand.vmem [shape: f32[32,1], index: 5, kind: input, shape index: {}]   ;;  %s1048_s6 = inlined_call_operand.vmem [shape: bf16[64,32], index: 6, kind: input, shape index: {}]   ;;  %s1049_s7 = inlined_call_operand.vmem [shape: f32[64,1], index: 7, kind: input, shape index: {}]   ;;  %s1050_s8 = inlined_call_operand.vmem [shape: bf16[32,64], index: 8, kind: input, shape index: {}]   ;;  %s1051_s9 = inlined_call_operand.vmem [shape: f32[32,1], index: 9, kind: input, shape index: {}]   ;;  %s1052_s10 = inlined_call_operand.hbm [shape: f32[1,1,128], index: 10, kind: output, shape index: {}]  }
   0x1   :  { %v51_v0 = vld [vmem:[%s1042_s0 + $0x70] sm:$0xff]  ;;  %v52_v1 = vld [vmem:[%s1042_s0 + $0x78] sm:$0xff]  ;;  %v49_v6 = vld [vmem:[%s1042_s0 + $0x60] sm:$0xff]  ;;  %717 = vset.pattern.permute.xlu0 %v754_v14  ;;  %718 = vset.pattern.permute.xlu1 %v754_v14 }
   0x2   :  { %v297_v2 = vld [vmem:[%s1043_s1 + $0x70] sm:$0xff]  ;;  %v60_v3 = vpack.c.bf16 %v52_v1, %v51_v0  ;;  %v298_v4 = vld [vmem:[%s1043_s1 + $0x78] sm:$0xff]  ;;  %v50_v7 = vld [vmem:[%s1042_s0 + $0x68] sm:$0xff]  ;;  %719 = vset.pattern.permute.xlu2 %v754_v14 }
   0x3   :  { %v306_v5 = vpack.c.bf16 %v298_v4, %v297_v2  ;;  %v295_v9 = vld [vmem:[%s1043_s1 + $0x60] sm:$0xff]  ;;  %v296_v10 = vld [vmem:[%s1043_s1 + $0x68] sm:$0xff]  ;;  %v59_v12 = vpack.c.bf16 %v50_v7, %v49_v6  ;;  %v321_v15 = vld [vmem:[%s1049_s7 + $0x30] sm:$0xff] }
   0x4   :  { %v172_v8 = vsel %vm137_vm0, %v60_v3, 0  ;;  %v305_v13 = vpack.c.bf16 %v296_v10, %v295_v9  ;;  %355 = vperm.xlu0 %717, %v321_v15  }
   0x5   :  { %174 = vmatpush.bf16.xpose.msra.mxu0 %v172_v8  ;;  %v417_v11 = vsel %vm137_vm0, %v306_v5, 0  ;;  %699 = vmatpush.bf16.xpose.msra.mxu1 %v172_v8 }
   0x6   :  { %419 = vmatpush.bf16.xpose.msra.mxu2 %v417_v11  ;;  %707 = vmatpush.bf16.xpose.msra.mxu3 %v417_v11 }
   0x7   :  { %15 = vsyncpa [#allocation3], 0  ;;  %v169_v16 = vsel %vm137_vm0, %v59_v12, 0  ;;  %v414_v17 = vsel %vm137_vm0, %v305_v13, 0  ;;  %v47_v18 = vld [vmem:[%s1042_s0 + $0x50] sm:$0xff]  ;;  %v48_v19 = vld [vmem:[%s1042_s0 + $0x58] sm:$0xff] }
   0x8   :  { %v293_v20 = vld [vmem:[%s1043_s1 + $0x50] sm:$0xff]  ;;  %v294_v21 = vld [vmem:[%s1043_s1 + $0x58] sm:$0xff]  ;;  %v58_v23 = vpack.c.bf16 %v48_v19, %v47_v18  ;;  %v45_v28 = vld [vmem:[%s1042_s0 + $0x40] sm:$0xff]  ;;  %vm253_vm1 = vcmask 523264   ;;  %s617_s20 = sshll.u32 %s1052_s10, 4  ;;  %s618_s20 = int_to_ptr.hbm [resolvable:$true] %s617_s20 }
   0x9   :  { %v75_v22 = vld [vmem:[%s1045_s3 + $0x30] sm:$0xff]  ;;  %v322_v24 = vld [vmem:[%s1049_s7 + $0x38] sm:$0xff]  ;;  %v304_v25 = vpack.c.bf16 %v294_v21, %v293_v20  ;;  %v46_v29 = vld [vmem:[%s1042_s0 + $0x48] sm:$0xff] }
   0xa   :  { %109 = vperm.xlu1 %718, %v75_v22   ;;  %v166_v26 = vsel %vm137_vm0, %v58_v23, 0  ;;  %v291_v30 = vld [vmem:[%s1043_s1 + $0x40] sm:$0xff]  ;;  %v292_v31 = vld [vmem:[%s1043_s1 + $0x48] sm:$0xff]  ;;  %v76_v32 = vld [vmem:[%s1045_s3 + $0x38] sm:$0xff]  ;;  %v57_v33 = vpack.c.bf16 %v46_v29, %v45_v28 }
   0xb   :  { %v411_v27 = vsel %vm137_vm0, %v304_v25, 0  ;;  %v73_v34 = vld [vmem:[%s1045_s3 + $0x20] sm:$0xff]  ;;  %v303_v35 = vpack.c.bf16 %v292_v31, %v291_v30  ;;  %v43_v38 = vld [vmem:[%s1042_s0 + $0x30] sm:$0xff]  ;;  %v44_v39 = vld [vmem:[%s1042_s0 + $0x38] sm:$0xff] }
   0xc   :  { %360 = vperm.xlu0 %717, %v322_v24   ;;  %v163_v36 = vsel %vm137_vm0, %v57_v33, 0  ;;  %v289_v40 = vld [vmem:[%s1043_s1 + $0x30] sm:$0xff]  ;;  %v290_v41 = vld [vmem:[%s1043_s1 + $0x38] sm:$0xff]  ;;  %v74_v42 = vld [vmem:[%s1045_s3 + $0x28] sm:$0xff]  ;;  %v56_v43 = vpack.c.bf16 %v44_v39, %v43_v38 }
   0xd   :  { %175 = vmatpush.bf16.xpose.msra.mxu0 %v169_v16  ;;  %700 = vmatpush.bf16.xpose.msra.mxu1 %v169_v16  ;;  %v408_v37 = vsel %vm137_vm0, %v303_v35, 0  ;;  %v318_v44 = vld [vmem:[%s1049_s7 + $0x18] sm:$0xff]  ;;  %v302_v45 = vpack.c.bf16 %v290_v41, %v289_v40  ;;  %v41_v48 = vld [vmem:[%s1042_s0 + $0x20] sm:$0xff]  ;;  %v42_v49 = vld [vmem:[%s1042_s0 + $0x28] sm:$0xff] }
   0xe   :  { %420 = vmatpush.bf16.xpose.msra.mxu2 %v414_v17  ;;  %708 = vmatpush.bf16.xpose.msra.mxu3 %v414_v17  ;;  %v160_v46 = vsel %vm137_vm0, %v56_v43, 0  ;;  %v287_v50 = vld [vmem:[%s1043_s1 + $0x20] sm:$0xff]  ;;  %v288_v51 = vld [vmem:[%s1043_s1 + $0x28] sm:$0xff]  ;;  %v71_v52 = vld [vmem:[%s1045_s3 + $0x10] sm:$0xff]  ;;  %v55_v54 = vpack.c.bf16 %v42_v49, %v41_v48 }
   0xf   :  { %v405_v47 = vsel %vm137_vm0, %v302_v45, 0  ;;  %v319_v53 = vld [vmem:[%s1049_s7 + $0x20] sm:$0xff]  ;;  %v301_v56 = vpack.c.bf16 %v288_v51, %v287_v50  ;;  %v285_v59 = vld [vmem:[%s1043_s1 + $0x10] sm:$0xff]  ;;  %v40_v61 = vld [vmem:[%s1042_s0 + $0x18] sm:$0xff] }
  0x10   :  { %v315_v55 = vld [vmem:[%s1049_s7] sm:$0xff]  ;;  %345 = vperm.xlu2 %719, %v319_v53   ;;  %v157_v57 = vsel %vm137_vm0, %v55_v54, 0  ;;  %v39_v60 = vld [vmem:[%s1042_s0 + $0x10] sm:$0xff]  ;;  %v286_v62 = vld [vmem:[%s1043_s1 + $0x18] sm:$0xff] }
  0x11   :  { %v402_v58 = vsel %vm137_vm0, %v301_v56, 0  ;;  %v316_v63 = vld [vmem:[%s1049_s7 + $0x8] sm:$0xff]  ;;  %v54_v2 = vpack.c.bf16 %v40_v61, %v39_v60  ;;  %v300_v3 = vpack.c.bf16 %v286_v62, %v285_v59  ;;  %v37_v6 = vld [vmem:[%s1042_s0] sm:$0xff]  ;;  %v317_v11 = vld [vmem:[%s1049_s7 + $0x10] sm:$0xff] }
  0x12   :  { %114 = vperm.xlu1 %718, %v76_v32   ;;  %v320_v0 = vld [vmem:[%s1049_s7 + $0x28] sm:$0xff]  ;;  %v283_v8 = vld [vmem:[%s1043_s1] sm:$0xff]  ;;  %v221_v12 = vld [vmem:[%s1047_s5 + $0x10] sm:$0xff] }
  0x13   :  { %v70_v1 = vld [vmem:[%s1045_s3 + $0x8] sm:$0xff]  ;;  %v154_v4 = vsel %vm137_vm0, %v54_v2, 0  ;;  %v399_v5 = vsel %vm137_vm0, %v300_v3, 0  ;;  %v219_v10 = vld [vmem:[%s1047_s5] sm:$0xff]  ;;  %v72_v18 = vld [vmem:[%s1045_s3 + $0x18] sm:$0xff] }
  0x14   :  { %99 = vperm.xlu0 %717, %v73_v34   ;;  %v38_v7 = vld [vmem:[%s1042_s0 + $0x8] sm:$0xff]  ;;  %v464_v17 = vld [vmem:[%s1051_s9] sm:$0xff]  ;;  %v222_v19 = vld [vmem:[%s1047_s5 + $0x18] sm:$0xff] }
  0x15   :  { %176 = vmatpush.bf16.xpose.msra.mxu0 %v166_v26  ;;  %701 = vmatpush.bf16.xpose.msra.mxu1 %v166_v26  ;;  %v284_v9 = vld [vmem:[%s1043_s1 + $0x8] sm:$0xff]  ;;  %v53_v13 = vpack.c.bf16 %v38_v7, %v37_v6  ;;  %v687_v20 = vld [vmem:[%s1044_s2] sm:$0xff]  ;;  %v690_v21 = vld [vmem:[%s1044_s2 + $0x18] sm:$0xff] }
  0x16   :  { %421 = vmatpush.bf16.xpose.msra.mxu2 %v411_v27  ;;  %709 = vmatpush.bf16.xpose.msra.mxu3 %v411_v27  ;;  %v299_v14 = vpack.c.bf16 %v284_v9, %v283_v8  ;;  %v693_v22 = vld [vmem:[%s1048_s6] sm:$0xff]  ;;  %v696_v23 = vld [vmem:[%s1048_s6 + $0x18] sm:$0xff]  ;;  %v466_v24 = vld [vmem:[%s1051_s9 + $0x10] sm:$0xff] }
  0x17   :  { %v151_v15 = vsel %vm137_vm0, %v53_v13, 0  ;;  %v69_v25 = vld [vmem:[%s1045_s3] sm:$0xff]  ;;  %v220_v26 = vld [vmem:[%s1047_s5 + $0x8] sm:$0xff]  ;;  %v467_v30 = vld [vmem:[%s1051_s9 + $0x18] sm:$0xff] }
  0x18   :  { %350 = vperm.xlu2 %719, %v320_v0   ;;  %v396_v16 = vsel %vm137_vm0, %v299_v14, 0  ;;  %v688_v27 = vld [vmem:[%s1044_s2 + $0x8] sm:$0xff]  ;;  %v689_v31 = vld [vmem:[%s1044_s2 + $0x10] sm:$0xff] }
  0x19   :  { %v694_v28 = vld [vmem:[%s1048_s6 + $0x8] sm:$0xff]  ;;  %v695_v32 = vld [vmem:[%s1048_s6 + $0x10] sm:$0xff] }
  0x1a   :  { %104 = vperm.xlu1 %718, %v74_v42   ;;  %v465_v29 = vld [vmem:[%s1051_s9 + $0x8] sm:$0xff] }
  0x1c   :  { %340 = vperm.xlu0 %717, %v318_v44  }
  0x1d   :  { %177 = vmatpush.bf16.xpose.msra.mxu0 %v163_v36  ;;  %702 = vmatpush.bf16.xpose.msra.mxu1 %v163_v36 }
  0x1e   :  { %422 = vmatpush.bf16.xpose.msra.mxu2 %v408_v37  ;;  %710 = vmatpush.bf16.xpose.msra.mxu3 %v408_v37 }
  0x20   :  { %335 = vperm.xlu2 %719, %v317_v11  }
  0x22   :  { %89 = vperm.xlu1 %718, %v71_v52  }
  0x24   :  { %325 = vperm.xlu0 %717, %v315_v55  }
  0x25   :  { %178 = vmatpush.bf16.xpose.msra.mxu0 %v160_v46  ;;  %703 = vmatpush.bf16.xpose.msra.mxu1 %v160_v46 }
  0x26   :  { %423 = vmatpush.bf16.xpose.msra.mxu2 %v405_v47  ;;  %711 = vmatpush.bf16.xpose.msra.mxu3 %v405_v47 }
  0x28   :  { %94 = vperm.xlu2 %719, %v72_v18  }
  0x2a   :  { %330 = vperm.xlu1 %718, %v316_v63  }
  0x2c   :  { %84 = vperm.xlu0 %717, %v70_v1  }
  0x2d   :  { %179 = vmatpush.bf16.xpose.msra.mxu0 %v157_v57  ;;  %704 = vmatpush.bf16.xpose.msra.mxu1 %v157_v57 }
  0x2e   :  { %424 = vmatpush.bf16.xpose.msra.mxu2 %v402_v58  ;;  %712 = vmatpush.bf16.xpose.msra.mxu3 %v402_v58 }
  0x30   :  { %79 = vperm.xlu2 %719, %v69_v25  }
  0x32   :  { %225 = vperm.xlu1 %718, %v219_v10  }
  0x34   :  { %235 = vperm.xlu0 %717, %v221_v12  }
  0x35   :  { %180 = vmatpush.bf16.xpose.msra.mxu0 %v154_v4  ;;  %705 = vmatpush.bf16.xpose.msra.mxu1 %v154_v4 }
  0x36   :  { %425 = vmatpush.bf16.xpose.msra.mxu2 %v399_v5  ;;  %713 = vmatpush.bf16.xpose.msra.mxu3 %v399_v5 }
  0x38   :  { %230 = vperm.xlu2 %719, %v220_v26  }
  0x3a   :  { %470 = vperm.xlu1 %718, %v464_v17  }
  0x3c   :  { %240 = vperm.xlu0 %717, %v222_v19  }
  0x3d   :  { %181 = vmatpush.bf16.xpose.msra.mxu0 %v151_v15  ;;  %706 = vmatpush.bf16.xpose.msra.mxu1 %v151_v15 }
  0x3e   :  { %426 = vmatpush.bf16.xpose.msra.mxu2 %v396_v16  ;;  %714 = vmatpush.bf16.xpose.msra.mxu3 %v396_v16 }
  0x40   :  { %475 = vperm.xlu2 %719, %v465_v29  }
  0x42   :  { %480 = vperm.xlu1 %718, %v466_v24  }
  0x44   :  { %642 = vmatmul.msk.bf16.vlgmr.msra.gmra.mxu0 %vm137_vm0, %v687_v20  ;;  %645 = vmatmul.msk.bf16.vlgmr.msra.gmra.mxu1 %vm137_vm0, %v690_v21 }
  0x45   :  { %672 = vmatmul.msk.bf16.vlgmr.msra.gmra.mxu2 %vm137_vm0, %v693_v22  ;;  %675 = vmatmul.msk.bf16.vlgmr.msra.gmra.mxu3 %vm137_vm0, %v696_v23 }
  0x48   :  { %485 = vperm.xlu2 %719, %v467_v30  }
  0x54   :  { %643 = vmatmul.msk.bf16.gmra.mxu0 %vm137_vm0, %v688_v27 }
  0x55   :  { %673 = vmatmul.msk.bf16.gmra.mxu2 %vm137_vm0, %v694_v28 }
  0x64   :  { %644 = vmatmul.msk.bf16.gmra.mxu0 %vm137_vm0, %v689_v31 }
  0x65   :  { %674 = vmatmul.msk.bf16.gmra.mxu2 %vm137_vm0, %v695_v32 }
  0x6a   :  { %v346_v37 = vpop.permute.xlu2 %345 }
  0x72   :  { %v351_v49 = vpop.permute.xlu2 %350 }
  0x76   :  { %v356_v33 = vpop.permute.xlu0 %355 }
  0x7a   :  { %v336_v59 = vpop.permute.xlu2 %335 }
  0x7c   :  { %v110_v34 = vpop.permute.xlu1 %109 }
  0x7e   :  { %v361_v38 = vpop.permute.xlu0 %360 }
  0x82   :  { %v95_v3 = vpop.permute.xlu2 %94 }
  0x84   :  { %v115_v40 = vpop.permute.xlu1 %114 }
  0x86   :  { %v100_v51 = vpop.permute.xlu0 %99 }
  0x8a   :  { %v80_v14 = vpop.permute.xlu2 %79 }
  0x8c   :  { %v105_v63 = vpop.permute.xlu1 %104 }
  0x8e   :  { %v341_v61 = vpop.permute.xlu0 %340 }
  0x94   :  { %v90_v7 = vpop.permute.xlu1 %89 }
  0x96   :  { %v326_v2 = vpop.permute.xlu0 %325 }
  0x9c   :  { %v331_v30 = vpop.permute.xlu1 %330 }
  0x9e   :  { %v85_v13 = vpop.permute.xlu0 %84 }
  0xc1   :  { %v183_v35 = vpop.f32.mrf.mxu0  ;;  %v198_v36 = vpop.f32.mrf.mxu1 }
  0xc2   :  { %v199_v39 = vadd.f32 %v198_v36, %v110_v34  ;;  %v184_v15 = vadd.f32 %v183_v35, %v80_v14 }
  0xc4   :  { %v209_v45 = vmax.f32 %v199_v39, 0.0  ;;  %v203_v24 = vmax.f32 %v184_v15, 0.0 }
  0xc8   :  { %v428_v41 = vpop.f32.mrf.mxu2  ;;  %v443_v42 = vpop.f32.mrf.mxu3 }
  0xc9   :  { %v185_v43 = vpop.f32.mrf.mxu0  ;;  %v200_v44 = vpop.f32.mrf.mxu1  ;;  %v444_v48 = vadd.f32 %v443_v42, %v356_v33  ;;  %v429_v35 = vadd.f32 %v428_v41, %v326_v2  ;;  %v692_v41 = vld [vmem:[%s1046_s4 + $0x8] sm:$0xff] }
  0xca   :  { %v201_v46 = vadd.f32 %v200_v44, %v115_v40  ;;  %v186_v16 = vadd.f32 %v185_v43, %v85_v13  ;;  %v697_v43 = vld [vmem:[%s1050_s8] sm:$0xff]  ;;  %v698_v44 = vld [vmem:[%s1050_s8 + $0x8] sm:$0xff] }
  0xcb   :  { %v454_v54 = vmax.f32 %v444_v48, 0.0  ;;  %v448_v40 = vmax.f32 %v429_v35, 0.0 }
  0xcc   :  { %v210_v47 = vmax.f32 %v201_v46, 0.0  ;;  %v204_v25 = vmax.f32 %v186_v16, 0.0 }
  0xce   :  { %v214_v50 = vpack.c.bf16 %v210_v47, %v209_v45  ;;  %v211_v34 = vpack.c.bf16 %v204_v25, %v203_v24  ;;  %v226_v47 = vpop.permute.xlu1 %225 }
  0xd0   :  { %v430_v52 = vpop.f32.mrf.mxu2  ;;  %v445_v53 = vpop.f32.mrf.mxu3  ;;  %264 = vmatpush.bf16.msrb.mxu1 %v214_v50 }
  0xd1   :  { %v188_v55 = vpop.f32.mrf.mxu0  ;;  %v446_v56 = vadd.f32 %v445_v53, %v361_v38  ;;  %v431_v31 = vadd.f32 %v430_v52, %v331_v30  ;;  %v231_v50 = vpop.permute.xlu2 %230 }
  0xd2   :  { %v189_v10 = vadd.f32 %v188_v55, %v90_v7 }
  0xd3   :  { %v455_v57 = vmax.f32 %v446_v56, 0.0  ;;  %v449_v38 = vmax.f32 %v431_v31, 0.0 }
  0xd4   :  { %v205_v20 = vmax.f32 %v189_v10, 0.0 }
  0xd5   :  { %v459_v58 = vpack.c.bf16 %v455_v57, %v454_v54  ;;  %v456_v42 = vpack.c.bf16 %v449_v38, %v448_v40 }
  0xd6   :  { %v471_v55 = vpop.permute.xlu1 %470 }
  0xd7   :  { %508 = vmatpush.bf16.msrb.mxu3 %v459_v58 }
  0xd8   :  { %v433_v60 = vpop.f32.mrf.mxu2 }
  0xd9   :  { %v190_v62 = vpop.f32.mrf.mxu0  ;;  %v434_v27 = vadd.f32 %v433_v60, %v336_v59  ;;  %v476_v2 = vpop.permute.xlu2 %475 }
  0xda   :  { %v191_v8 = vadd.f32 %v190_v62, %v95_v3 }
  0xdb   :  { %v450_v36 = vmax.f32 %v434_v27, 0.0 }
  0xdc   :  { %v206_v17 = vmax.f32 %v191_v8, 0.0 }
  0xde   :  { %v212_v26 = vpack.c.bf16 %v206_v17, %v205_v20 }
  0xe0   :  { %v435_v0 = vpop.f32.mrf.mxu2 }
  0xe1   :  { %v193_v1 = vpop.f32.mrf.mxu0  ;;  %v436_v22 = vadd.f32 %v435_v0, %v341_v61 }
  0xe2   :  { %v194_v4 = vadd.f32 %v193_v1, %v100_v51 }
  0xe3   :  { %v451_v32 = vmax.f32 %v436_v22, 0.0 }
  0xe4   :  { %v207_v11 = vmax.f32 %v194_v4, 0.0 }
  0xe5   :  { %v457_v39 = vpack.c.bf16 %v451_v32, %v450_v36 }
  0xe8   :  { %v438_v5 = vpop.f32.mrf.mxu2 }
  0xe9   :  { %v195_v6 = vpop.f32.mrf.mxu0  ;;  %v439_v19 = vadd.f32 %v438_v5, %v346_v37  ;;  %v691_v37 = vld [vmem:[%s1046_s4] sm:$0xff]  ;;  %s755_s4 = smov [#allocation2]  }
  0xea   :  { %v196_v9 = vadd.f32 %v195_v6, %v105_v63  ;;  %v481_v6 = vpop.permute.xlu1 %480  ;;  %s615_s8 = sshll.u32 %s755_s4, 4  ;;  %s616_s8 = int_to_ptr.vmem [resolvable:$true] %s615_s8 }
  0xeb   :  { %v452_v28 = vmax.f32 %v439_v19, 0.0  ;;  %v486_v19 = vpop.permute.xlu2 %485 }
  0xec   :  { %v208_v12 = vmax.f32 %v196_v9, 0.0 }
  0xee   :  { %v213_v18 = vpack.c.bf16 %v208_v12, %v207_v11 }
  0xf0   :  { %v440_v21 = vpop.f32.mrf.mxu2  ;;  %265 = vmatpush.bf16.msrb.mxu1 %v213_v18 }
  0xf1   :  { %v441_v23 = vadd.f32 %v440_v21, %v351_v49  ;;  %v236_v49 = vpop.permute.xlu0 %235 }
  0xf3   :  { %v453_v29 = vmax.f32 %v441_v23, 0.0 }
  0xf4   :  { %266 = vmatpush.bf16.msrb.mxu1 %v212_v26 }
  0xf5   :  { %v458_v33 = vpack.c.bf16 %v453_v29, %v452_v28 }
  0xf7   :  { %509 = vmatpush.bf16.msrb.mxu3 %v458_v33 }
  0xf8   :  { %267 = vmatpush.bf16.msrb.mxu1 %v211_v34 }
  0xf9   :  { %v241_v61 = vpop.permute.xlu0 %240 }
  0xfb   :  { %510 = vmatpush.bf16.msrb.mxu3 %v457_v39  ;;  %654 = vmatmul.msk.bf16.vlgmr.msrb.gmra.mxu1 %vm253_vm1, %v691_v37 }
  0xff   :  { %511 = vmatpush.bf16.msrb.mxu3 %v456_v42 }
 0x102   :  { %684 = vmatmul.msk.bf16.vlgmr.msrb.gmra.mxu3 %vm253_vm1, %v697_v43 }
 0x10b   :  { %655 = vmatmul.msk.bf16.gmra.mxu1 %vm253_vm1, %v692_v41 }
 0x112   :  { %685 = vmatmul.msk.bf16.gmra.mxu3 %vm253_vm1, %v698_v44 }
 0x178   :  { %v269_v45 = vpop.f32.mrf.mxu1 }
 0x179   :  { %v270_v53 = vadd.f32 %v269_v45, %v226_v47 }
 0x17b   :  { %v279_v57 = vmax.f32 %v270_v53, 0.0 }
 0x17d   :  { %v540_v63 = vmul.f32 %v279_v57, %v279_v57 }
 0x180   :  { %v271_v46 = vpop.f32.mrf.mxu1 }
 0x181   :  { %v272_v51 = vadd.f32 %v271_v46, %v231_v50 }
 0x183   :  { %v280_v56 = vmax.f32 %v272_v51, 0.0 }
 0x185   :  { %v513_v48 = vpop.f32.mrf.mxu3  ;;  %v541_v60 = vmul.f32 %v280_v56, %v280_v56 }
 0x186   :  { %v514_v10 = vadd.f32 %v513_v48, %v471_v55 }
 0x187   :  { %v544_v3 = vadd.f32 %v541_v60, %v540_v63 }
 0x188   :  { %v274_v52 = vpop.f32.mrf.mxu1  ;;  %v523_v15 = vmax.f32 %v514_v10, 0.0 }
 0x189   :  { %v275_v54 = vadd.f32 %v274_v52, %v236_v49 }
 0x18a   :  { %v553_v22 = vmul.f32 %v523_v15, %v523_v15  ;;  %v527_v33 = vmul.f32 %v523_v15, %v279_v57 }
 0x18b   :  { %v281_v58 = vmax.f32 %v275_v54, 0.0 }
 0x18d   :  { %v515_v59 = vpop.f32.mrf.mxu3  ;;  %v542_v0 = vmul.f32 %v281_v58, %v281_v58 }
 0x18e   :  { %v516_v5 = vadd.f32 %v515_v59, %v476_v2 }
 0x18f   :  { %v545_v7 = vadd.f32 %v544_v3, %v542_v0 }
 0x190   :  { %v276_v62 = vpop.f32.mrf.mxu1  ;;  %v524_v13 = vmax.f32 %v516_v5, 0.0 }
 0x191   :  { %v277_v1 = vadd.f32 %v276_v62, %v241_v61 }
 0x192   :  { %v554_v18 = vmul.f32 %v524_v13, %v524_v13  ;;  %v528_v29 = vmul.f32 %v524_v13, %v280_v56 }
 0x193   :  { %v282_v4 = vmax.f32 %v277_v1, 0.0 }
 0x194   :  { %v557_v26 = vadd.f32 %v554_v18, %v553_v22  ;;  %v531_v37 = vadd.f32 %v528_v29, %v527_v33 }
 0x195   :  { %v543_v8 = vmul.f32 %v282_v4, %v282_v4  ;;  %v518_v9 = vpop.f32.mrf.mxu3 }
 0x196   :  { %v519_v11 = vadd.f32 %v518_v9, %v481_v6 }
 0x197   :  { %v546_v12 = vadd.f32 %v545_v7, %v543_v8 }
 0x198   :  { %v525_v16 = vmax.f32 %v519_v11, 0.0 }
 0x199   :  { %v547_v14 = vrot.slane %v546_v12, 4 }
 0x19a   :  { %v555_v23 = vmul.f32 %v525_v16, %v525_v16  ;;  %v529_v34 = vmul.f32 %v525_v16, %v281_v58 }
 0x19b   :  { %v548_v17 = vadd.f32 %v547_v14, %v546_v12 }
 0x19c   :  { %v558_v30 = vadd.f32 %v557_v26, %v555_v23  ;;  %v532_v40 = vadd.f32 %v531_v37, %v529_v34 }
 0x19d   :  { %v549_v20 = vrot.slane %v548_v17, 2  ;;  %v520_v21 = vpop.f32.mrf.mxu3 }
 0x19e   :  { %v521_v24 = vadd.f32 %v520_v21, %v486_v19 }
 0x19f   :  { %v550_v25 = vadd.f32 %v549_v20, %v548_v17 }
 0x1a0   :  { %v526_v27 = vmax.f32 %v521_v24, 0.0 }
 0x1a1   :  { %v551_v28 = vrot.slane %v550_v25, 1 }
 0x1a2   :  { %v556_v31 = vmul.f32 %v526_v27, %v526_v27  ;;  %v530_v38 = vmul.f32 %v526_v27, %v282_v4 }
 0x1a3   :  { %v552_v32 = vadd.f32 %v551_v28, %v550_v25 }
 0x1a4   :  { %v559_v35 = vadd.f32 %v558_v30, %v556_v31  ;;  %v533_v43 = vadd.f32 %v532_v40, %v530_v38 }
 0x1a5   :  { %v566_v36 = vmax.f32 %v552_v32, 1e-16 }
 0x1a6   :  { %v560_v39 = vrot.slane %v559_v35, 4  ;;  %v534_v47 = vrot.slane %v533_v43, 4 }
 0x1a7   :  { %720 = vrsqrt.f32 %v566_v36  ;;  %vm573_vm3 = vweird.f32 %v566_v36 }
 0x1a8   :  { %v561_v42 = vadd.f32 %v560_v39, %v559_v35  ;;  %v535_v51 = vadd.f32 %v534_v47, %v533_v43 }
 0x1aa   :  { %v562_v41 = vrot.slane %v561_v42, 2  ;;  %v536_v54 = vrot.slane %v535_v51, 2 }
 0x1ac   :  { %v563_v44 = vadd.f32 %v562_v41, %v561_v42  ;;  %v537_v57 = vadd.f32 %v536_v54, %v535_v51 }
 0x1ad   :  { %v721_v45 = vpop.eup %720 }
 0x1ae   :  { %v568_v46 = vmul.f32 %v721_v45, %v566_v36  ;;  %v564_v48 = vrot.slane %v563_v44, 1  ;;  %vm574_vm2 = vweird.f32 %v721_v45  ;;  %v538_v61 = vrot.slane %v537_v57, 1 }
 0x1af   :  { %vm575_vm4 = vmor %vm573_vm3, %vm574_vm2 }
 0x1b0   :  { %v565_v49 = vadd.f32 %v564_v48, %v563_v44  ;;  %v569_v50 = vmul.f32 %v721_v45, %v568_v46  ;;  %v539_v1 = vadd.f32 %v538_v61, %v537_v57 }
 0x1b2   :  { %v578_v52 = vmax.f32 %v565_v49, 1e-16  ;;  %v570_v53 = vmul.f32 0.5, %v569_v50 }
 0x1b4   :  { %722 = vrsqrt.f32 %v578_v52  ;;  %v571_v55 = vsub.f32 1.5, %v570_v53  ;;  %vm585_vm6 = vweird.f32 %v578_v52 }
 0x1b6   :  { %v572_v59 = vmul.f32 %v721_v45, %v571_v55 }
 0x1b8   :  { %v576_v63 = vsel %vm575_vm4, %v721_v45, %v572_v59 }
 0x1b9   :  { %v577_v3 = vmul.f32 %v576_v63, %v539_v1 }
 0x1ba   :  { %v723_v56 = vpop.eup %722 }
 0x1bb   :  { %v580_v58 = vmul.f32 %v723_v56, %v578_v52  ;;  %vm586_vm5 = vweird.f32 %v723_v56 }
 0x1bc   :  { %vm587_vm7 = vmor %vm585_vm6, %vm586_vm5 }
 0x1bd   :  { %v581_v60 = vmul.f32 %v723_v56, %v580_v58 }
 0x1bf   :  { %v582_v62 = vmul.f32 0.5, %v581_v60 }
 0x1c1   :  { %v583_v0 = vsub.f32 1.5, %v582_v62 }
 0x1c3   :  { %v584_v2 = vmul.f32 %v723_v56, %v583_v0 }
 0x1c5   :  { %v588_v4 = vsel %vm587_vm7, %v723_v56, %v584_v2 }
 0x1c6   :  { %v589_v5 = vmul.f32 %v588_v4, %v577_v3 }
 0x1c8   :  { %v686_v6 = vmul.f32 -1.442695, %v589_v5 }
 0x1ca   :  { %724 = vpow2.f32 %v686_v6 }
 0x1d0   :  { %v725_v7 = vpop.eup %724 }
 0x1d1   :  { %v593_v8 = vadd.f32 1.0, %v725_v7 }
 0x1d3   :  { %726 = vrcp.f32 %v593_v8  ;;  %v605_v12 = vand.u32 2147483648, %v593_v8  ;;  %v603_v14 = vand.u32 2147483647, %v593_v8  ;;  %vm599_vm9 = vweird.f32 %v593_v8 }
 0x1d5   :  { %v606_v16 = vor.u32 1.1754944e-38, %v605_v12  ;;  %vm604_vm11 = vcmp.eq.f32.partialorder %v603_v14, 8.507059e+37 }
 0x1d9   :  { %v727_v9 = vpop.eup %726 }
 0x1da   :  { %v595_v10 = vmul.f32 %v727_v9, %v593_v8  ;;  %vm600_vm8 = vweird.f32 %v727_v9 }
 0x1db   :  { %vm601_vm10 = vmor %vm599_vm9, %vm600_vm8 }
 0x1dc   :  { %v596_v11 = vsub.f32 1.0, %v595_v10 }
 0x1de   :  { %v597_v13 = vmul.f32 %v727_v9, %v596_v11 }
 0x1e0   :  { %v598_v15 = vadd.f32 %v727_v9, %v597_v13 }
 0x1e2   :  { %v602_v17 = vsel %vm601_vm10, %v727_v9, %v598_v15 }
 0x1e3   :  { %v607_v18 = vsel %vm604_vm11, %v606_v16, %v602_v17 }
 0x1e4   :  { %609 = vst [vmem:[#allocation2] sm:$0x1] %v607_v18 }
 0x1e5   :  { %620 = dma.vmem_to_hbm [thread:$0]  %s616_s8, 16, %s618_s20, [#allocation3]  }
 0x1e6   :  { %752 = dma.done.wait [#allocation3], 16  }
 0x1e7   :  { %753 = vsyncadd [#allocation3], 4294967280 }
 0x1e8   :  { %625 = vsyncpa [#allocation3], 1 }

</bundles_post_ra>
